<compile_context>
chip_gen: v7x
topology: tpu7x:2x2x1
jax: 0.10.0
libtpu: 0.0.40
codegen_flags: <defaults>
</compile_context>

<pallas_src>
import functools
import math

import jax
import jax.numpy as jnp
from jax.experimental import pallas as pl
from jax.experimental.pallas import tpu as pltpu


# ----------------------------- Linear: x @ W + b -----------------------------

def _linear_kernel(x_ref, w_ref, b_ref, o_ref):
    x = x_ref[...].astype(jnp.float32)
    w = w_ref[...].astype(jnp.float32)
    acc = jnp.dot(x, w, preferred_element_type=jnp.float32)   # MXU, f32 accum
    o_ref[...] = (acc + b_ref[...].astype(jnp.float32)).astype(o_ref.dtype)


def _pick_col_tile(d_out, tile_cols):
    """Largest lane-dense (multiple-of-128) column tile dividing d_out, else full."""
    if d_out <= tile_cols:
        return d_out
    tn = (tile_cols // 128) * 128
    while tn >= 128:
        if d_out % tn == 0:
            return tn
        tn -= 128
    return d_out


def linear(x2, w, b, *, tile_rows=256, tile_cols=512):
    """x2: (rows, d_in), w: (d_in, d_out), b: (d_out,) -> (rows, d_out)."""
    rows, d_in = x2.shape
    d_out = w.shape[1]

    # Large row tiles: this kernel is HBM-streaming bound; tiny tiles would be
    # dominated by per-grid-step overhead.  (For bf16 inputs, keep tile_rows a
    # multiple of 16 for dense sublane packing.)
    if rows > tile_rows:
        tm = tile_rows
        rows_p = pl.cdiv(rows, tm) * tm
    else:
        tm = rows
        rows_p = rows
    if rows_p != rows:
        x2 = jnp.pad(x2, ((0, rows_p - rows), (0, 0)))

    tn = _pick_col_tile(d_out, tile_cols)

    out = pl.pallas_call(
        _linear_kernel,
        out_shape=jax.ShapeDtypeStruct((rows_p, d_out), x2.dtype),
        grid_spec=pl.GridSpec(
            grid=(rows_p // tm, d_out // tn),
            in_specs=[
                pl.BlockSpec((tm, d_in), lambda i, j: (i, 0)),   # activations
                pl.BlockSpec((d_in, tn), lambda i, j: (0, j)),   # weights
                pl.BlockSpec((1, tn), lambda i, j: (0, j)),      # bias
            ],
            out_specs=pl.BlockSpec((tm, tn), lambda i, j: (i, j)),
        ),
        compiler_params=pltpu.CompilerParams(
            dimension_semantics=("parallel", "parallel")),
    )(x2, w, b.reshape(1, d_out))
    return out[:rows]


# ------------------- Scaled-dot-product attention (per head) ------------------

def _attention_kernel(q_ref, k_ref, v_ref, o_ref, *, scale, p_drop, training, seed):
    q = q_ref[0].astype(jnp.float32)          # (seq_q, d_k)
    k = k_ref[0].astype(jnp.float32)          # (seq_k, d_k)
    v = v_ref[0].astype(jnp.float32)          # (seq_k, d_k)

    # scores = Q K^T / sqrt(d_k): contract the d_k axes, no explicit transpose.
    s = jax.lax.dot_general(q, k, (((1,), (1,)), ((), ())),
                            preferred_element_type=jnp.float32) * scale

    # Numerically stable softmax over keys.
    m = jnp.max(s, axis=-1, keepdims=True)
    e = jnp.exp(s - m)
    p = e / jnp.sum(e, axis=-1, keepdims=True)

    if training and p_drop > 0.0:
        # Dropout on attention weights via the TPU hardware PRNG, integer
        # threshold mask (no float convert / compare on the VALU slot).
        # TODO(synk): mask is not bit-identical to torch.nn.Dropout (different RNG);
        # also not exercised in the eval-mode demo below.
        pltpu.prng_seed(jnp.int32(seed) + pl.program_id(0))
        bits = pltpu.bitcast(pltpu.prng_random_bits(p.shape), jnp.uint32)
        thresh = jnp.uint32(min(int(round(p_drop * (2 ** 32))), 2 ** 32 - 1))
        keep = bits >= thresh
        p = jnp.where(keep, p * (1.0 / (1.0 - p_drop)), 0.0)

    o = jnp.dot(p, v, preferred_element_type=jnp.float32)     # (seq_q, d_k)
    o_ref[0] = o.astype(o_ref.dtype)


# ------------------------------ Full forward pass -----------------------------

def multi_head_attention(q, k, v, params, *, nhead, dropout_p=0.0,
                         training=False, seed=0):
    """Equivalent of the PyTorch MultiHeadAttention.forward (eval-mode dropout=id)."""
    batch, seq_q, d_model = q.shape
    seq_k = k.shape[1]
    assert d_model % nhead == 0
    d_k = d_model // nhead

    # Projections.
    Q = linear(q.reshape(batch * seq_q, d_model), params["wq"], params["bq"])
    K = linear(k.reshape(batch * seq_k, d_model), params["wk"], params["bk"])
    V = linear(v.reshape(batch * seq_k, d_model), params["wv"], params["bv"])

    def split_heads(x2, seq):
        # (batch*seq, d_model) -> (batch*nhead, seq, d_k)
        return (x2.reshape(batch, seq, nhead, d_k)
                  .transpose(0, 2, 1, 3)
                  .reshape(batch * nhead, seq, d_k))

    Qh, Kh, Vh = split_heads(Q, seq_q), split_heads(K, seq_k), split_heads(V, seq_k)

    # Mix the user seed so consecutive seeds don't alias neighbouring tiles' streams.
    mixed_seed = (int(seed) * 2654435761) % (2 ** 31)
    kernel = functools.partial(
        _attention_kernel, scale=1.0 / math.sqrt(d_k),
        p_drop=float(dropout_p), training=bool(training), seed=mixed_seed)

    # TODO(synk): for long sequences this holds the full (seq, seq) score tile in
    # VMEM; a flash-style kv-tiled variant would be needed beyond a few K tokens.
    attn = pl.pallas_call(
        kernel,
        out_shape=jax.ShapeDtypeStruct((batch * nhead, seq_q, d_k), q.dtype),
        grid_spec=pl.GridSpec(
            grid=(batch * nhead,),
            in_specs=[
                pl.BlockSpec((1, seq_q, d_k), lambda i: (i, 0, 0)),
                pl.BlockSpec((1, seq_k, d_k), lambda i: (i, 0, 0)),
                pl.BlockSpec((1, seq_k, d_k), lambda i: (i, 0, 0)),
            ],
            out_specs=pl.BlockSpec((1, seq_q, d_k), lambda i: (i, 0, 0)),
        ),
        compiler_params=pltpu.CompilerParams(
            dimension_semantics=("parallel",)),
    )(Qh, Kh, Vh)

    # Merge heads and apply the output projection.
    concat = (attn.reshape(batch, nhead, seq_q, d_k)
                  .transpose(0, 2, 1, 3)
                  .reshape(batch * seq_q, d_model))
    out = linear(concat, params["wo"], params["bo"])
    return out.reshape(batch, seq_q, d_model)


# ------------------------------ Pure-JAX reference ----------------------------

def _reference_mha(q, k, v, params, *, nhead):
    batch, seq_q, d_model = q.shape
    d_k = d_model // nhead
    Q = q @ params["wq"] + params["bq"]
    K = k @ params["wk"] + params["bk"]
    V = v @ params["wv"] + params["bv"]
    Qh = Q.reshape(batch, seq_q, nhead, d_k).transpose(0, 2, 1, 3)
    Kh = K.reshape(batch, -1, nhead, d_k).transpose(0, 2, 1, 3)
    Vh = V.reshape(batch, -1, nhead, d_k).transpose(0, 2, 1, 3)
    s = jnp.einsum("bhqd,bhkd->bhqk", Qh, Kh) / math.sqrt(d_k)
    w = jax.nn.softmax(s, axis=-1)
    attn = jnp.einsum("bhqk,bhkd->bhqd", w, Vh)
    concat = attn.transpose(0, 2, 1, 3).reshape(batch, seq_q, d_model)
    return concat @ params["wo"] + params["bo"]


if __name__ == "__main__":
    batch, seq, d_model, nhead = 2, 8, 32, 4
    dropout_p = 0.1

    key = jax.random.PRNGKey(0)
    ks = jax.random.split(key, 11)
    q = jax.random.normal(ks[0], (batch, seq, d_model), jnp.float32)
    k = jax.random.normal(ks[1], (batch, seq, d_model), jnp.float32)
    v = jax.random.normal(ks[2], (batch, seq, d_model), jnp.float32)

    # Weights stored in "x @ W + b" layout (i.e. torch Linear weight transposed).
    wscale = 1.0 / math.sqrt(d_model)
    params = {
        "wq": jax.random.normal(ks[3], (d_model, d_model), jnp.float32) * wscale,
        "bq": jax.random.normal(ks[4], (d_model,), jnp.float32) * 0.1,
        "wk": jax.random.normal(ks[5], (d_model, d_model), jnp.float32) * wscale,
        "bk": jax.random.normal(ks[6], (d_model,), jnp.float32) * 0.1,
        "wv": jax.random.normal(ks[7], (d_model, d_model), jnp.float32) * wscale,
        "bv": jax.random.normal(ks[8], (d_model,), jnp.float32) * 0.1,
        "wo": jax.random.normal(ks[9], (d_model, d_model), jnp.float32) * wscale,
        "bo": jax.random.normal(ks[10], (d_model,), jnp.float32) * 0.1,
    }

    # Eval-mode forward (dropout is identity, matching module.eval()).
    out = multi_head_attention(q, k, v, params, nhead=nhead,
                               dropout_p=dropout_p, training=False)
    out = jax.block_until_ready(out)

    ref = _reference_mha(q, k, v, params, nhead=nhead)
    assert out.shape == (batch, seq, d_model)
    assert jnp.allclose(out, ref, atol=1e-4, rtol=1e-4), "mismatch vs reference"

    print("KERNEL_OK")
</pallas_src>

<mosaic_0001>
module attributes {stable_mosaic.version = 11 : i64} {
  func.func @_linear_kernel(%arg0: i32, %arg1: i32, %arg2: memref<16x32xf32, #tpu.memory_space<vmem>>, %arg3: memref<32x32xf32, #tpu.memory_space<vmem>>, %arg4: memref<1x32xf32, #tpu.memory_space<vmem>>, %arg5: memref<16x32xf32, #tpu.memory_space<vmem>>) attributes {dimension_semantics = [#tpu.dimension_semantics<parallel>, #tpu.dimension_semantics<parallel>], iteration_bounds = array<i64: 1, 1>, scalar_prefetch = 0 : i64, scratch_operands = 0 : i64, tpu.core_type = #tpu.core_type<tc>, window_params = [{transform_indices = @transform_0, window_bounds = array<i64: 16, 32>}, {transform_indices = @transform_1, window_bounds = array<i64: 32, 32>}, {transform_indices = @transform_2, window_bounds = array<i64: 1, 32>}, {transform_indices = @transform_3, window_bounds = array<i64: 16, 32>}]} {
    %c0 = arith.constant 0 : index
    %c0_0 = arith.constant 0 : index
    %0 = vector.load %arg2[%c0, %c0_0] : memref<16x32xf32, #tpu.memory_space<vmem>>, vector<16x32xf32>
    %c0_1 = arith.constant 0 : index
    %c0_2 = arith.constant 0 : index
    %1 = vector.load %arg3[%c0_1, %c0_2] : memref<32x32xf32, #tpu.memory_space<vmem>>, vector<32x32xf32>
    %cst = arith.constant dense<0.000000e+00> : vector<16x32xf32>
    %2 = tpu.matmul %0, %1, %cst {dimension_numbers = #tpu.dot_dimension_numbers<[1], [0], [0], [1], [0, 0, 1, 1], [], []>} : vector<16x32xf32>, vector<32x32xf32>, vector<16x32xf32> -> vector<16x32xf32>
    %c0_3 = arith.constant 0 : index
    %c0_4 = arith.constant 0 : index
    %3 = vector.load %arg4[%c0_3, %c0_4] : memref<1x32xf32, #tpu.memory_space<vmem>>, vector<1x32xf32>
    %4 = vector.broadcast %3 : vector<1x32xf32> to vector<16x32xf32>
    %5 = arith.addf %2, %4 : vector<16x32xf32>
    %c0_5 = arith.constant 0 : index
    %c0_6 = arith.constant 0 : index
    %6 = vector.load %arg5[%c0_5, %c0_6] : memref<16x32xf32, #tpu.memory_space<vmem>>, vector<16x32xf32>
    tpu.vector_store %arg5[%c0_5, %c0_6], %5 {strides = array<i32>} : memref<16x32xf32, #tpu.memory_space<vmem>>, vector<16x32xf32>,
    return
  }
  func.func @transform_0(%arg0: i32, %arg1: i32) -> (i32, i32) {
    %c0_i32 = arith.constant 0 : i32
    %c0_i32_0 = arith.constant 0 : i32
    return %arg0, %c0_i32 : i32, i32
  }
  func.func @transform_1(%arg0: i32, %arg1: i32) -> (i32, i32) {
    %c0_i32 = arith.constant 0 : i32
    %c0_i32_0 = arith.constant 0 : i32
    return %c0_i32, %arg1 : i32, i32
  }
  func.func @transform_2(%arg0: i32, %arg1: i32) -> (i32, i32) {
    %c0_i32 = arith.constant 0 : i32
    %c0_i32_0 = arith.constant 0 : i32
    return %c0_i32, %arg1 : i32, i32
  }
  func.func @transform_3(%arg0: i32, %arg1: i32) -> (i32, i32) {
    %c0_i32 = arith.constant 0 : i32
    return %arg0, %arg1 : i32, i32
  }
}

</mosaic_0001>

<bundles_post_ra>
// kernel: tpu_custom_call.1
= control target key start
LH: loop header
LB: loop body
LE: loop exit
PB: predicated region body
PF: predicated region fallthrough
CT: control target
= control target key end

     0   :  { %8 = vsyncpa [#allocation3], 0  ;;  %s340_s0 = inlined_call_operand.hbm [shape: f32[16,32], index: 0, kind: input, shape index: {}]   ;;  %s341_s1 = inlined_call_operand.hbm [shape: f32[32,32], index: 1, kind: input, shape index: {}]   ;;  %s342_s2 = inlined_call_operand.vmem [shape: f32[1,32], index: 2, kind: input, shape index: {}]   ;;  %s343_s3 = inlined_call_operand.hbm [shape: f32[16,32], index: 3, kind: output, shape index: {}]  }
   0x1   :  { %9 = vsyncpa [#allocation6], 0 }
   0x2   :  { %10 = vsyncpa [#allocation4], 0  ;;  %s263_s12 = smov [#allocation2]   ;;  %s191_s16 = scalar_lea.hbm %s340_s0, 256 }
   0x3   :  { %s16_s13 = sshll.u32 %s263_s12, 4  ;;  %p192_p0 = scmp.ne.s32.totalorder %s340_s0, %s191_s16  ;;  %s17_s13 = int_to_ptr.vmem [resolvable:$true] %s16_s13 }
   0x4   :  { %p195_p1 = scmp.lt.u32.totalorder %s191_s16, %s340_s0 }
   0x6   :  { %p197_p2 = pnand %p195_p1, %p192_p0 }
   0x8   :  { %200 = shalt.err (!%p197_p2)
}
   0x9   :  { %s201_s21 = scalar_lea.vmem %s17_s13, 256  ;;  %p206_p4 = scmp.lt.s32.totalorder %s17_s13, %s17_s13 }
   0xa   :  { %p202_p3 = scmp.ne.s32.totalorder %s17_s13, %s201_s21  ;;  %p207_p5 = scmp.lt.s32.totalorder %s201_s21, %s201_s21 }
   0xc   :  { %p208_p6 = por %p207_p5, %p206_p4 }
   0xe   :  { %p209_p7 = pnand %p208_p6, %p202_p3 }
  0x10   :  { %212 = shalt.err (!%p209_p7)
}
  0x11   :  { %s264_s22 = smov 128   ;;  %s265_s23 = smov 8  }
  0x12   :  { %22 = dma.hbm_to_vmem [thread:$0]  %s340_s0, 256, %s17_s13, [#allocation3], %s264_s22, %s264_s22, %s265_s23  }
  0x13   :  { %s266_s26 = smov [#allocation5]   ;;  %s213_s30 = scalar_lea.hbm %s341_s1, 512 }
  0x14   :  { %s28_s27 = sshll.u32 %s266_s26, 4  ;;  %p214_p8 = scmp.ne.s32.totalorder %s341_s1, %s213_s30  ;;  %s29_s27 = int_to_ptr.vmem [resolvable:$true] %s28_s27 }
  0x15   :  { %p217_p9 = scmp.lt.u32.totalorder %s213_s30, %s341_s1 }
  0x17   :  { %p219_p10 = pnand %p217_p9, %p214_p8 }
  0x19   :  { %222 = shalt.err (!%p219_p10)
}
  0x1a   :  { %s223_s8 = scalar_lea.vmem %s29_s27, 512  ;;  %p228_p12 = scmp.lt.s32.totalorder %s29_s27, %s29_s27 }
  0x1b   :  { %p224_p11 = scmp.ne.s32.totalorder %s29_s27, %s223_s8  ;;  %p229_p13 = scmp.lt.s32.totalorder %s223_s8, %s223_s8 }
  0x1d   :  { %p230_p0 = por %p229_p13, %p228_p12 }
  0x1f   :  { %p231_p1 = pnand %p230_p0, %p224_p11 }
  0x21   :  { %234 = shalt.err (!%p231_p1)
}
  0x22   :  { %34 = dma.hbm_to_vmem [thread:$0]  %s341_s1, 512, %s29_s27, [#allocation6], %s264_s22, %s264_s22, %s265_s23  }
  0x23   :  { %257 = dma.done.wait [#allocation3], 256  }
  0x24   :  { %258 = vsyncadd [#allocation3], 4294967040 }
  0x25   :  { %259 = dma.done.wait [#allocation6], 512  }
  0x26   :  { %260 = vsyncadd [#allocation6], 4294966784  ;;  %vm56_vm0 = vcmask 261120   ;;  %v45_v0 = vld [vmem:[#allocation5] sm:$0xff]  ;;  %v46_v1 = vld [vmem:[#allocation5 + $0x8] sm:$0xff]  ;;  %s267_s11 = smov [#allocation7]  }
  0x27   :  { %v47_v2 = vld [vmem:[#allocation5 + $0x10] sm:$0xff]  ;;  %v178_v3 = vpack.c.bf16 %v46_v1, %v45_v0  ;;  %v48_v4 = vld [vmem:[#allocation5 + $0x18] sm:$0xff]  ;;  %s145_s12 = sshll.u32 %s267_s11, 4  ;;  %s146_s12 = int_to_ptr.vmem [resolvable:$true] %s145_s12 }
  0x28   :  { %v43_v5 = vld [vmem:[#allocation2] sm:$0xff]  ;;  %v182_v6 = vpack.c.bf16 %v48_v4, %v47_v2  ;;  %v44_v7 = vld [vmem:[#allocation2 + $0x8] sm:$0xff]  ;;  %s235_s13 = scalar_lea.vmem %s146_s12, 256  ;;  %p240_p3 = scmp.lt.s32.totalorder %s146_s12, %s146_s12 }
  0x29   :  { %175 = vmatprep.mubr.msk.f32.mxu0 %vm56_vm0, %v43_v5  ;;  %179 = vmatprep.subr.bf16.mxu0 %v178_v3  ;;  %v158_v8 = vld [vmem:[%s342_s2] ss:$0 sm:$0xff]  ;;  %p236_p2 = scmp.ne.s32.totalorder %s146_s12, %s235_s13  ;;  %p241_p4 = scmp.lt.s32.totalorder %s235_s13, %s235_s13 }
  0x2a   :  { %181 = vmatpush3.bf16.msra.mxu0 %v178_v3 }
  0x2b   :  { %183 = vmatprep.subr.bf16.mxu0 %v182_v6  ;;  %p242_p5 = por %p241_p4, %p240_p3 }
  0x2d   :  { %p243_p6 = pnand %p242_p5, %p236_p2 }
  0x2e   :  { %185 = vmatpush3.bf16.msra.mxu0 %v182_v6 }
  0x31   :  { %176 = vmatmul.mubr.msk.f32.vlgmr.msra.gmra.mrb[0].mxu0 %vm56_vm0, %v44_v7 }
 0x104   :  { %v177_v9 = vpop.f32.mrb[0].mxu0 }
 0x105   :  { %v135_v10 = vadd.f32 %v177_v9, %v158_v8  ;;  %v129_v11 = vpop.f32.mrb[1].mxu0 }
 0x106   :  { %v130_v12 = vadd.f32 %v158_v8, %v129_v11 }
 0x107   :  { %139 = vst.msk [vmem:[#allocation7 + $0x8] sm:$0xff] %vm56_vm0, %v135_v10 }
 0x108   :  { %138 = vst.msk [vmem:[#allocation7] sm:$0xff] %vm56_vm0, %v130_v12 }
 0x109   :  { %246 = shalt.err (!%p243_p6)
}
 0x10a   :  { %s247_s15 = scalar_lea.hbm %s343_s3, 256 }
 0x10b   :  { %p248_p7 = scmp.ne.s32.totalorder %s343_s3, %s247_s15  ;;  %p251_p8 = scmp.lt.u32.totalorder %s247_s15, %s343_s3 }
 0x10d   :  { %p253_p9 = pnand %p251_p8, %p248_p7 }
 0x10f   :  { %256 = shalt.err (!%p253_p9)
}
 0x110   :  { %151 = dma.vmem_to_hbm [thread:$0]  %s146_s12, 256, %s343_s3, [#allocation4], %s264_s22, %s264_s22, %s265_s23  }
 0x111   :  { %261 = dma.done.wait [#allocation4], 256  }
 0x112   :  { %262 = vsyncadd [#allocation4], 4294967040 }
 0x113   :  { %155 = vsyncpa [#allocation3], 1 }
 0x114   :  { %156 = vsyncpa [#allocation6], 1 }
 0x115   :  { %157 = vsyncpa [#allocation4], 1 }

</bundles_post_ra>
